<compile_context>
chip_gen: v7x
topology: tpu7x:2x2x1
jax: 0.10.0
libtpu: 0.0.40
codegen_flags: <defaults>
</compile_context>

<pallas_src>
import jax
import jax.numpy as jnp
from jax.experimental import pallas as pl
from jax.experimental.pallas import tpu as pltpu


def _round_up(v, m):
    return (v + m - 1) // m * m


# ----------------------------- kernels --------------------------------------


def _mcc_fused_kernel(x_ref, w1_ref, b1_ref, w2_ref, b2_ref, out_ref):
    """One batch tile; weights/biases fully VMEM-resident (constant index_map)."""
    h = jnp.dot(x_ref[...], w1_ref[...], preferred_element_type=jnp.float32)
    h = jnp.maximum(h + b1_ref[...], 0.0)                     # bias + ReLU (f32)
    out = jnp.dot(h.astype(w2_ref.dtype), w2_ref[...],
                  preferred_element_type=jnp.float32) + b2_ref[...]
    out_ref[...] = out.astype(out_ref.dtype)


def _mcc_ktiled_kernel(x_ref, w1_ref, b1_ref, w2_ref, b2_ref, out_ref, acc_ref):
    """(batch-tile, K-tile) grid for very large feat; w1 streamed per K tile."""
    k = pl.program_id(1)
    part = jnp.dot(x_ref[...], w1_ref[...], preferred_element_type=jnp.float32)

    @pl.when(k == 0)
    def _():
        acc_ref[...] = part                # assign: no zero-fill + read pass

    @pl.when(k > 0)
    def _():
        acc_ref[...] += part

    @pl.when(k == pl.num_programs(1) - 1)
    def _():
        h = jnp.maximum(acc_ref[...] + b1_ref[...], 0.0)
        out = jnp.dot(h.astype(w2_ref.dtype), w2_ref[...],
                      preferred_element_type=jnp.float32) + b2_ref[...]
        out_ref[...] = out.astype(out_ref.dtype)


# ----------------------------- helpers ---------------------------------------


def _pick_tm(B_pad, max_tm):
    """Largest multiple-of-8 divisor of B_pad that is <= max_tm; prefer >= 2
    batch tiles when that is possible (so v7x's two TensorCores both get work)."""
    max_tm = max(8, max_tm)
    cands = [d for d in range(8, min(B_pad, max_tm) + 1, 8) if B_pad % d == 0]
    if not cands:
        return B_pad
    best = max(cands)
    if B_pad // best < 2:
        two = [d for d in cands if B_pad // d >= 2]
        if two:
            best = max(two)
    return best


def _pick_tk(K_pad, max_tk=2048):
    """Largest multiple-of-128 divisor of K_pad that is <= max_tk (no K re-pad)."""
    cands = [d for d in range(128, min(K_pad, max_tk) + 1, 128) if K_pad % d == 0]
    return max(cands) if cands else K_pad


def _pad_to(a, shape, dtype):
    """Cast + zero-pad only when needed (no-op when already conforming)."""
    if a.dtype != dtype:
        a = a.astype(dtype)
    pads = tuple((0, t - s) for s, t in zip(a.shape, shape))
    if any(p for _, p in pads):
        a = jnp.pad(a, pads)
    return a


# ----------------------------- wrapper ----------------------------------------


def multi_class_classifier_forward(x, w1, b1, w2, b2, *,
                                   compute_dtype=jnp.float32,
                                   resident_w1_budget_bytes=8 << 20):
    """x: (B, feat); w1: (feat, hidden); b1: (hidden,); w2: (hidden, C); b2: (C,)."""
    B, feat = x.shape
    hidden = w1.shape[1]
    num_classes = w2.shape[1]

    cdt = jnp.dtype(compute_dtype)
    itemsize = cdt.itemsize

    # Lane-dense padding (128 on lane axes); batch only to a multiple of 8.
    K_pad = _round_up(feat, 128)
    H_pad = _round_up(hidden, 128)
    N_pad = _round_up(num_classes, 128)
    B_pad = _round_up(B, 8)

    w1_bytes = K_pad * H_pad * itemsize
    use_fused = w1_bytes <= resident_w1_budget_bytes     # w1 resident in VMEM?
    k_block = K_pad if use_fused else _pick_tk(K_pad)

    # Keep the (double-buffered) x tile within ~12 MiB of VMEM.
    x_tile_budget = 12 << 20
    max_tm = min(512, (x_tile_budget // (2 * k_block * itemsize)) // 8 * 8)
    tm = _pick_tm(B_pad, max_tm)

    xp = _pad_to(x, (B_pad, K_pad), cdt)
    w1p = _pad_to(w1, (K_pad, H_pad), cdt)
    b1p = _pad_to(jnp.reshape(b1, (1, -1)), (1, H_pad), jnp.float32)
    w2p = _pad_to(w2, (H_pad, N_pad), cdt)
    b2p = _pad_to(jnp.reshape(b2, (1, -1)), (1, N_pad), jnp.float32)

    if use_fused:
        grid = (B_pad // tm,)
        needed = (2 * tm * K_pad * itemsize          # x tiles (double-buffered)
                  + 2 * w1_bytes                     # w1 (conservative 2 bufs)
                  + 2 * H_pad * N_pad * itemsize     # w2
                  + 2 * (H_pad + N_pad) * 4          # biases
                  + 2 * tm * N_pad * 4               # out tiles
                  + tm * H_pad * 4)                  # hidden intermediate
        vmem_limit = int(min(max(needed + (4 << 20), 24 << 20), 64 << 20))

        out_padded = pl.pallas_call(
            _mcc_fused_kernel,
            out_shape=jax.ShapeDtypeStruct((B_pad, N_pad), jnp.float32),
            grid_spec=pltpu.PrefetchScalarGridSpec(
                num_scalar_prefetch=0,
                grid=grid,
                in_specs=[
                    pl.BlockSpec((tm, K_pad), lambda i: (i, 0)),       # x streamed
                    pl.BlockSpec((K_pad, H_pad), lambda i: (0, 0)),    # w1 resident
                    pl.BlockSpec((1, H_pad), lambda i: (0, 0)),        # b1 resident
                    pl.BlockSpec((H_pad, N_pad), lambda i: (0, 0)),    # w2 resident
                    pl.BlockSpec((1, N_pad), lambda i: (0, 0)),        # b2 resident
                ],
                out_specs=pl.BlockSpec((tm, N_pad), lambda i: (i, 0)),
            ),
            compiler_params=pltpu.CompilerParams(
                dimension_semantics=("parallel",),
                vmem_limit_bytes=vmem_limit,
            ),
        )(xp, w1p, b1p, w2p, b2p)
    else:
        tk = k_block
        grid = (B_pad // tm, K_pad // tk)
        needed = (2 * tm * tk * itemsize
                  + 2 * tk * H_pad * itemsize
                  + 2 * H_pad * N_pad * itemsize
                  + 2 * (H_pad + N_pad) * 4
                  + 2 * tm * N_pad * 4
                  + tm * H_pad * 4)                  # acc scratch
        vmem_limit = int(min(max(needed + (4 << 20), 24 << 20), 64 << 20))

        out_padded = pl.pallas_call(
            _mcc_ktiled_kernel,
            out_shape=jax.ShapeDtypeStruct((B_pad, N_pad), jnp.float32),
            grid_spec=pltpu.PrefetchScalarGridSpec(
                num_scalar_prefetch=0,
                grid=grid,
                in_specs=[
                    pl.BlockSpec((tm, tk), lambda i, k: (i, k)),        # x
                    pl.BlockSpec((tk, H_pad), lambda i, k: (k, 0)),     # w1 streamed
                    pl.BlockSpec((1, H_pad), lambda i, k: (0, 0)),      # b1
                    pl.BlockSpec((H_pad, N_pad), lambda i, k: (0, 0)),  # w2
                    pl.BlockSpec((1, N_pad), lambda i, k: (0, 0)),      # b2
                ],
                out_specs=pl.BlockSpec((tm, N_pad), lambda i, k: (i, 0)),
                scratch_shapes=[pltpu.VMEM((tm, H_pad), jnp.float32)],
            ),
            compiler_params=pltpu.CompilerParams(
                dimension_semantics=("parallel", "arbitrary"),
                vmem_limit_bytes=vmem_limit,
            ),
        )(xp, w1p, b1p, w2p, b2p)

    return out_padded[:B, :num_classes]


def init_params(key, num_WKs, num_classes):
    feat = 16 * num_WKs * num_classes
    hidden = 64
    k = jax.random.split(key, 4)
    w1 = jax.random.normal(k[0], (feat, hidden), jnp.float32) * (1.0 / jnp.sqrt(feat))
    b1 = jax.random.normal(k[1], (hidden,), jnp.float32) * 0.01
    w2 = jax.random.normal(k[2], (hidden, num_classes), jnp.float32) * (1.0 / jnp.sqrt(hidden))
    b2 = jax.random.normal(k[3], (num_classes,), jnp.float32) * 0.01
    return w1, b1, w2, b2


if __name__ == "__main__":
    num_WKs, num_classes = 2, 3
    B = 2
    feat = 16 * num_WKs * num_classes  # 96

    key = jax.random.PRNGKey(0)
    k_x, k_p = jax.random.split(key)
    x = jax.random.normal(k_x, (B, feat), jnp.float32)
    w1, b1, w2, b2 = init_params(k_p, num_WKs, num_classes)

    # jit the wrapper so any pad/cast fuses into a single pass over each operand.
    fwd = jax.jit(multi_class_classifier_forward,
                  static_argnames=("compute_dtype", "resident_w1_budget_bytes"))

    out = fwd(x, w1, b1, w2, b2)
    out = jax.block_until_ready(out)
    assert out.shape == (B, num_classes), out.shape

    # Reference in plain JAX (mirrors the PyTorch Sequential).
    ref = jnp.maximum(x @ w1 + b1, 0.0) @ w2 + b2
    assert jnp.allclose(out, ref, atol=1e-4, rtol=1e-4), (
        float(jnp.max(jnp.abs(out - ref)))
    )

    print("KERNEL_OK")
</pallas_src>

<mosaic_0001>
module attributes {stable_mosaic.version = 11 : i64} {
  func.func @_mcc_fused_kernel(%arg0: i32, %arg1: memref<8x128xf32, #tpu.memory_space<vmem>>, %arg2: memref<128x128xf32, #tpu.memory_space<vmem>>, %arg3: memref<1x128xf32, #tpu.memory_space<vmem>>, %arg4: memref<128x128xf32, #tpu.memory_space<vmem>>, %arg5: memref<1x128xf32, #tpu.memory_space<vmem>>, %arg6: memref<8x128xf32, #tpu.memory_space<vmem>>) attributes {dimension_semantics = [#tpu.dimension_semantics<parallel>], iteration_bounds = array<i64: 1>, scalar_prefetch = 0 : i64, scratch_operands = 0 : i64, tpu.core_type = #tpu.core_type<tc>, window_params = [{transform_indices = @transform_0, window_bounds = array<i64: 8, 128>}, {pipeline_mode = #tpu.pipeline_mode<synchronous>, transform_indices = @transform_1, window_bounds = array<i64: 128, 128>}, {pipeline_mode = #tpu.pipeline_mode<synchronous>, transform_indices = @transform_2, window_bounds = array<i64: 1, 128>}, {pipeline_mode = #tpu.pipeline_mode<synchronous>, transform_indices = @transform_3, window_bounds = array<i64: 128, 128>}, {pipeline_mode = #tpu.pipeline_mode<synchronous>, transform_indices = @transform_4, window_bounds = array<i64: 1, 128>}, {transform_indices = @transform_5, window_bounds = array<i64: 8, 128>}]} {
    %c0 = arith.constant 0 : index
    %c0_0 = arith.constant 0 : index
    %0 = vector.load %arg1[%c0, %c0_0] : memref<8x128xf32, #tpu.memory_space<vmem>>, vector<8x128xf32>
    %c0_1 = arith.constant 0 : index
    %c0_2 = arith.constant 0 : index
    %1 = vector.load %arg2[%c0_1, %c0_2] : memref<128x128xf32, #tpu.memory_space<vmem>>, vector<128x128xf32>
    %cst = arith.constant dense<0.000000e+00> : vector<8x128xf32>
    %2 = tpu.matmul %0, %1, %cst {dimension_numbers = #tpu.dot_dimension_numbers<[1], [0], [0], [1], [0, 0, 1, 1], [], []>} : vector<8x128xf32>, vector<128x128xf32>, vector<8x128xf32> -> vector<8x128xf32>
    %c0_3 = arith.constant 0 : index
    %c0_4 = arith.constant 0 : index
    %3 = vector.load %arg3[%c0_3, %c0_4] : memref<1x128xf32, #tpu.memory_space<vmem>>, vector<1x128xf32>
    %4 = vector.broadcast %3 : vector<1x128xf32> to vector<8x128xf32>
    %5 = arith.addf %2, %4 : vector<8x128xf32>
    %cst_5 = arith.constant 0.000000e+00 : f32
    %6 = vector.broadcast %cst_5 : f32 to vector<8x128xf32>
    %7 = arith.maximumf %5, %6 : vector<8x128xf32>
    %c0_6 = arith.constant 0 : index
    %c0_7 = arith.constant 0 : index
    %8 = vector.load %arg4[%c0_6, %c0_7] : memref<128x128xf32, #tpu.memory_space<vmem>>, vector<128x128xf32>
    %cst_8 = arith.constant dense<0.000000e+00> : vector<8x128xf32>
    %9 = tpu.matmul %7, %8, %cst_8 {dimension_numbers = #tpu.dot_dimension_numbers<[1], [0], [0], [1], [0, 0, 1, 1], [], []>} : vector<8x128xf32>, vector<128x128xf32>, vector<8x128xf32> -> vector<8x128xf32>
    %c0_9 = arith.constant 0 : index
    %c0_10 = arith.constant 0 : index
    %10 = vector.load %arg5[%c0_9, %c0_10] : memref<1x128xf32, #tpu.memory_space<vmem>>, vector<1x128xf32>
    %11 = vector.broadcast %10 : vector<1x128xf32> to vector<8x128xf32>
    %12 = arith.addf %9, %11 : vector<8x128xf32>
    %c0_11 = arith.constant 0 : index
    %c0_12 = arith.constant 0 : index
    %13 = vector.load %arg6[%c0_11, %c0_12] : memref<8x128xf32, #tpu.memory_space<vmem>>, vector<8x128xf32>
    tpu.vector_store %arg6[%c0_11, %c0_12], %12 {strides = array<i32>} : memref<8x128xf32, #tpu.memory_space<vmem>>, vector<8x128xf32>,
    return
  }
  func.func @transform_0(%arg0: i32) -> (i32, i32) {
    %c0_i32 = arith.constant 0 : i32
    %c0_i32_0 = arith.constant 0 : i32
    return %arg0, %c0_i32 : i32, i32
  }
  func.func @transform_1(%arg0: i32) -> (i32, i32) {
    %c0_i32 = arith.constant 0 : i32
    %c0_i32_0 = arith.constant 0 : i32
    %c0_i32_1 = arith.constant 0 : i32
    return %c0_i32, %c0_i32_0 : i32, i32
  }
  func.func @transform_2(%arg0: i32) -> (i32, i32) {
    %c0_i32 = arith.constant 0 : i32
    %c0_i32_0 = arith.constant 0 : i32
    %c0_i32_1 = arith.constant 0 : i32
    return %c0_i32, %c0_i32_0 : i32, i32
  }
  func.func @transform_3(%arg0: i32) -> (i32, i32) {
    %c0_i32 = arith.constant 0 : i32
    %c0_i32_0 = arith.constant 0 : i32
    %c0_i32_1 = arith.constant 0 : i32
    return %c0_i32, %c0_i32_0 : i32, i32
  }
  func.func @transform_4(%arg0: i32) -> (i32, i32) {
    %c0_i32 = arith.constant 0 : i32
    %c0_i32_0 = arith.constant 0 : i32
    %c0_i32_1 = arith.constant 0 : i32
    return %c0_i32, %c0_i32_0 : i32, i32
  }
  func.func @transform_5(%arg0: i32) -> (i32, i32) {
    %c0_i32 = arith.constant 0 : i32
    %c0_i32_0 = arith.constant 0 : i32
    return %arg0, %c0_i32 : i32, i32
  }
}

</mosaic_0001>

<bundles_post_ra>
// kernel: multi_class_classifier_forward.1
= control target key start
LH: loop header
LB: loop body
LE: loop exit
PB: predicated region body
PF: predicated region fallthrough
CT: control target
= control target key end

     0   :  { %v370_v0 = vmov 0.0|0.0   ;;  %vm371_vm0 = vmmov 0   ;;  %v372_v4 = vmov 0.0   ;;  %s527_s1 = inlined_call_operand.vmem [shape: f32[128,128], index: 1, kind: input, shape index: {}]   ;;  %s528_s3 = inlined_call_operand.vmem [shape: f32[128,128], index: 3, kind: input, shape index: {}]   ;;  %s529_s0 = inlined_call_operand.vmem [shape: f32[8,128], index: 0, kind: input, shape index: {}]   ;;  %s530_s2 = inlined_call_operand.vmem [shape: f32[1,128], index: 2, kind: input, shape index: {}]   ;;  %s531_s4 = inlined_call_operand.vmem [shape: f32[1,128], index: 4, kind: input, shape index: {}]   ;;  %s532_s5 = inlined_call_operand.vmem [shape: f32[8,128], index: 5, kind: output, shape index: {}]  }
   0x1   :  { %319 = vmatprep.subr.bf16.mxu0 %v370_v0  ;;  %v21_v1 = vld [vmem:[%s527_s1] sm:$0xff]  ;;  %v22_v2 = vld [vmem:[%s527_s1 + $0x8] sm:$0xff]  ;;  %v23_v3 = vld [vmem:[%s527_s1 + $0x10] sm:$0xff]  ;;  %281 = vmatprep.mubr.msk.f32.mxu0 %vm371_vm0, %v372_v4 }
   0x2   :  { %v320_v5 = vpack.c.bf16 %v22_v2, %v21_v1  ;;  %v24_v6 = vld [vmem:[%s527_s1 + $0x18] sm:$0xff]  ;;  %343 = vmatprep.subr.bf16.mxu1 %v370_v0  ;;  %316 = vmatprep.mubr.msk.f32.mxu1 %vm371_vm0, %v372_v4  ;;  %v25_v8 = vld [vmem:[%s527_s1 + $0x20] sm:$0xff]  ;;  %v26_v9 = vld [vmem:[%s527_s1 + $0x28] sm:$0xff] }
   0x3   :  { %v323_v7 = vpack.c.bf16 %v24_v6, %v23_v3  ;;  %v115_v10 = vld [vmem:[%s528_s3] sm:$0xff]  ;;  %v116_v11 = vld [vmem:[%s528_s3 + $0x8] sm:$0xff]  ;;  %v117_v12 = vld [vmem:[%s528_s3 + $0x10] sm:$0xff]  ;;  %v326_v14 = vpack.c.bf16 %v26_v9, %v25_v8 }
   0x4   :  { %321 = vmatpush3.bf16.msra.mxu0 %v320_v5  ;;  %v118_v13 = vld [vmem:[%s528_s3 + $0x18] sm:$0xff]  ;;  %v344_v15 = vpack.c.bf16 %v116_v11, %v115_v10  ;;  %v27_v16 = vld [vmem:[%s527_s1 + $0x30] sm:$0xff]  ;;  %v119_v19 = vld [vmem:[%s528_s3 + $0x20] sm:$0xff] }
   0x5   :  { %322 = vmatprep.subr.bf16.mxu0 %v370_v0  ;;  %v28_v17 = vld [vmem:[%s527_s1 + $0x38] sm:$0xff]  ;;  %v347_v18 = vpack.c.bf16 %v118_v13, %v117_v12  ;;  %v120_v20 = vld [vmem:[%s528_s3 + $0x28] sm:$0xff]  ;;  %v29_v22 = vld [vmem:[%s527_s1 + $0x40] sm:$0xff] }
   0x6   :  { %345 = vmatpush3.bf16.msra.mxu1 %v344_v15  ;;  %v329_v21 = vpack.c.bf16 %v28_v17, %v27_v16  ;;  %v30_v23 = vld [vmem:[%s527_s1 + $0x48] sm:$0xff]  ;;  %v350_v24 = vpack.c.bf16 %v120_v20, %v119_v19  ;;  %v121_v25 = vld [vmem:[%s528_s3 + $0x30] sm:$0xff]  ;;  %v122_v26 = vld [vmem:[%s528_s3 + $0x38] sm:$0xff] }
   0x7   :  { %346 = vmatprep.subr.bf16.mxu1 %v370_v0  ;;  %v332_v27 = vpack.c.bf16 %v30_v23, %v29_v22  ;;  %v31_v28 = vld [vmem:[%s527_s1 + $0x50] sm:$0xff]  ;;  %v32_v29 = vld [vmem:[%s527_s1 + $0x58] sm:$0xff]  ;;  %v353_v30 = vpack.c.bf16 %v122_v26, %v121_v25  ;;  %v123_v31 = vld [vmem:[%s528_s3 + $0x40] sm:$0xff] }
   0x8   :  { %324 = vmatpush3.bf16.msra.mxu0 %v323_v7  ;;  %v124_v32 = vld [vmem:[%s528_s3 + $0x48] sm:$0xff]  ;;  %v335_v33 = vpack.c.bf16 %v32_v29, %v31_v28  ;;  %v33_v34 = vld [vmem:[%s527_s1 + $0x60] sm:$0xff]  ;;  %v125_v37 = vld [vmem:[%s528_s3 + $0x50] sm:$0xff] }
   0x9   :  { %325 = vmatprep.subr.bf16.mxu0 %v370_v0  ;;  %v34_v35 = vld [vmem:[%s527_s1 + $0x68] sm:$0xff]  ;;  %v356_v36 = vpack.c.bf16 %v124_v32, %v123_v31  ;;  %v126_v38 = vld [vmem:[%s528_s3 + $0x58] sm:$0xff]  ;;  %v35_v40 = vld [vmem:[%s527_s1 + $0x70] sm:$0xff] }
   0xa   :  { %348 = vmatpush3.bf16.msra.mxu1 %v347_v18  ;;  %v338_v39 = vpack.c.bf16 %v34_v35, %v33_v34  ;;  %v36_v41 = vld [vmem:[%s527_s1 + $0x78] sm:$0xff]  ;;  %v359_v42 = vpack.c.bf16 %v126_v38, %v125_v37  ;;  %v127_v43 = vld [vmem:[%s528_s3 + $0x60] sm:$0xff]  ;;  %v128_v44 = vld [vmem:[%s528_s3 + $0x68] sm:$0xff] }
   0xb   :  { %349 = vmatprep.subr.bf16.mxu1 %v370_v0  ;;  %v341_v45 = vpack.c.bf16 %v36_v41, %v35_v40  ;;  %v362_v46 = vpack.c.bf16 %v128_v44, %v127_v43  ;;  %v20_v47 = vld [vmem:[%s529_s0] sm:$0xff]  ;;  %v129_v48 = vld [vmem:[%s528_s3 + $0x70] sm:$0xff]  ;;  %v130_v49 = vld [vmem:[%s528_s3 + $0x78] sm:$0xff] }
   0xc   :  { %327 = vmatpush3.bf16.msra.mxu0 %v326_v14  ;;  %v365_v50 = vpack.c.bf16 %v130_v49, %v129_v48  ;;  %v213_v51 = vld [vmem:[%s530_s2] ss:$0 sm:$0xff] }
   0xd   :  { %328 = vmatprep.subr.bf16.mxu0 %v370_v0  ;;  %v214_v56 = vld [vmem:[%s531_s4] ss:$0 sm:$0xff] }
   0xe   :  { %351 = vmatpush3.bf16.msra.mxu1 %v350_v24 }
   0xf   :  { %352 = vmatprep.subr.bf16.mxu1 %v370_v0 }
  0x10   :  { %330 = vmatpush3.bf16.msra.mxu0 %v329_v21 }
  0x11   :  { %331 = vmatprep.subr.bf16.mxu0 %v370_v0 }
  0x12   :  { %354 = vmatpush3.bf16.msra.mxu1 %v353_v30 }
  0x13   :  { %355 = vmatprep.subr.bf16.mxu1 %v370_v0 }
  0x14   :  { %333 = vmatpush3.bf16.msra.mxu0 %v332_v27 }
  0x15   :  { %334 = vmatprep.subr.bf16.mxu0 %v370_v0 }
  0x16   :  { %357 = vmatpush3.bf16.msra.mxu1 %v356_v36 }
  0x17   :  { %358 = vmatprep.subr.bf16.mxu1 %v370_v0 }
  0x18   :  { %336 = vmatpush3.bf16.msra.mxu0 %v335_v33 }
  0x19   :  { %337 = vmatprep.subr.bf16.mxu0 %v370_v0 }
  0x1a   :  { %360 = vmatpush3.bf16.msra.mxu1 %v359_v42 }
  0x1b   :  { %361 = vmatprep.subr.bf16.mxu1 %v370_v0 }
  0x1c   :  { %339 = vmatpush3.bf16.msra.mxu0 %v338_v39 }
  0x1d   :  { %340 = vmatprep.subr.bf16.mxu0 %v370_v0 }
  0x1e   :  { %363 = vmatpush3.bf16.msra.mxu1 %v362_v46 }
  0x1f   :  { %364 = vmatprep.subr.bf16.mxu1 %v370_v0 }
  0x20   :  { %342 = vmatpush3.bf16.msra.mxu0 %v341_v45 }
  0x22   :  { %366 = vmatpush3.bf16.msra.mxu1 %v365_v50 }
  0x23   :  { %282 = vmatmul.mubr.f32.vlgmr.msra.gmra.mrb[0].mxu0 %v20_v47 }
  0xf6   :  { %v110_v52 = vpop.f32.mrb[0].mxu0 }
  0xf7   :  { %v111_v53 = vadd.f32 %v213_v51, %v110_v52  ;;  %v283_v54 = vpop.f32.mrb[1].mxu0 }
  0xf9   :  { %v114_v55 = vmax.f32 %v111_v53, 0.0 }
  0xfb   :  { %317 = vmatmul.mubr.f32.vlgmr.msra.gmra.mrb[0].mxu1 %v114_v55 }
 0x1ce   :  { %v204_v57 = vpop.f32.mrb[0].mxu1 }
 0x1cf   :  { %v205_v58 = vadd.f32 %v214_v56, %v204_v57  ;;  %v318_v59 = vpop.f32.mrb[1].mxu1 }
 0x1d1   :  { %208 = vst [vmem:[%s532_s5] sm:$0xff] %v205_v58 }

</bundles_post_ra>
